<compile_context>
chip_gen: v7x
topology: tpu7x:2x2x1
jax: 0.10.0
libtpu: 0.0.40
codegen_flags: <defaults>
</compile_context>

<pallas_src>
import functools

import jax
import jax.numpy as jnp
from jax.experimental import pallas as pl
from jax.experimental.pallas import tpu as pltpu


def _pat_kernel(out_ref, lbl_ref, thr_ref, pat_ref, *, s_true, ts, mask_tail):
    # out_ref, lbl_ref : (TR, TS) f32 VMEM tiles of the flattened inputs
    # thr_ref          : (TR, 1)  f32 per-row thresholds
    # pat_ref          : (TR, 1)  f32 output, resident across the spatial axis
    si = pl.program_id(1)

    @pl.when(si == 0)
    def _init():
        pat_ref[...] = jnp.zeros_like(pat_ref)

    diff = jnp.abs(out_ref[...] - lbl_ref[...])                 # (TR, TS)
    above = (diff > thr_ref[...]).astype(jnp.float32)           # broadcast (TR,1)

    if mask_tail:
        pos = si * ts + jax.lax.broadcasted_iota(jnp.int32, above.shape, 1)
        above = jnp.where(pos < s_true, above, 0.0)

    pat_ref[...] += jnp.sum(above, axis=1, keepdims=True)

    @pl.when(si == pl.num_programs(1) - 1)
    def _finalize():
        # Match PyTorch ordering: (count / (H*W)) * 100
        pat_ref[...] = (pat_ref[...] / float(s_true)) * 100.0


def _round_down(x, m):
    return (x // m) * m


def pat_loss(output, label, pat_thresholds, *, block_budget_bytes=2 * 1024 * 1024):
    """Pallas equivalent of PATLoss.forward. Returns (B, len(pat_thresholds)) f32."""
    output = jnp.asarray(output, jnp.float32)
    label = jnp.asarray(label, jnp.float32)
    if output.ndim == 3:
        output = output[:, None]
        label = label[:, None]
    B, C, H, W = output.shape
    T = len(pat_thresholds)
    assert C <= T, "PyTorch module indexes thresholds by channel; need C <= len(thresholds)"

    S = H * W
    R = B * C

    # Lane-dense, channel/batch-fused layout. Contiguous -> metadata-only reshape.
    out2d = output.reshape(R, S)
    lbl2d = label.reshape(R, S)
    # Row b*C + c gets pat_thresholds[c].
    thr = jnp.tile(jnp.asarray(pat_thresholds[:C], jnp.float32), B).reshape(R, 1)

    # ---- tile selection -------------------------------------------------
    # Target ~block_budget_bytes per input block; 2 inputs x 2 pipeline
    # buffers stays well under the default scoped VMEM on v5e/v6e/v7x.
    min_tr = R if R < 8 else 8
    if min_tr * S * 4 <= block_budget_bytes:
        # Regime 1: full spatial extent per block, grow the row tile.
        ts = S
        if R <= 8:
            tr = R
        else:
            tr = min(R, max(8, _round_down(block_budget_bytes // (S * 4), 8)))
    else:
        # Regime 2: huge spatial slab -> tile the reduction axis (mult of 128).
        tr = min_tr
        ts = max(128, _round_down(block_budget_bytes // (tr * 4), 128))
        if ts >= S:
            ts = S

    mask_tail = (S % ts) != 0
    grid = (pl.cdiv(R, tr), pl.cdiv(S, ts))

    kernel = functools.partial(_pat_kernel, s_true=S, ts=ts, mask_tail=mask_tail)

    pat_col = pl.pallas_call(
        kernel,
        out_shape=jax.ShapeDtypeStruct((R, 1), jnp.float32),
        grid=grid,
        in_specs=[
            pl.BlockSpec((tr, ts), lambda ri, si: (ri, si)),   # output tile
            pl.BlockSpec((tr, ts), lambda ri, si: (ri, si)),   # label tile
            pl.BlockSpec((tr, 1), lambda ri, si: (ri, 0)),     # per-row thresholds
        ],
        out_specs=pl.BlockSpec((tr, 1), lambda ri, si: (ri, 0)),
        compiler_params=pltpu.CompilerParams(
            dimension_semantics=("parallel", "arbitrary")),
    )(out2d, lbl2d, thr)

    pat_c = pat_col.reshape(B, C)
    if T > C:
        # PyTorch pre-allocates zeros((B, T)) and only fills the first C columns.
        pat_c = jnp.pad(pat_c, ((0, 0), (0, T - C)))
    return pat_c


def _pat_loss_ref(output, label, pat_thresholds):
    """Pure-JAX reference matching the PyTorch forward."""
    output = jnp.asarray(output, jnp.float32)
    label = jnp.asarray(label, jnp.float32)
    if output.ndim == 3:
        output = output[:, None]
        label = label[:, None]
    B, C, H, W = output.shape
    T = len(pat_thresholds)
    pat = jnp.zeros((B, T), jnp.float32)
    for idx in range(C):
        cnt = jnp.sum(
            (jnp.abs(output[:, idx] - label[:, idx]) > pat_thresholds[idx]).astype(jnp.float32),
            axis=(1, 2),
        )
        pat = pat.at[:, idx].set(cnt / (H * W))
    return pat * 100.0


if __name__ == "__main__":
    key = jax.random.PRNGKey(0)

    # --- primary small-shape check (module-consistent shapes) -------------
    B, C, H, W = 2, 4, 16, 16
    pat_thresholds = [0.1, 0.25, 0.5, 0.75]
    k_out, k_lbl, key = (*jax.random.split(key, 2), key)
    out = jax.random.normal(k_out, (B, C, H, W), dtype=jnp.float32)
    lbl = jax.random.normal(k_lbl, (B, C, H, W), dtype=jnp.float32)
    pat = jax.block_until_ready(pat_loss(out, lbl, pat_thresholds))
    ref = _pat_loss_ref(out, lbl, pat_thresholds)
    assert pat.shape == (B, len(pat_thresholds))
    assert jnp.allclose(pat, ref, atol=1e-5), (pat, ref)

    # --- extra check: T > len-of-channels, odd spatial, R < 8 --------------
    B2, C2, H2, W2 = 3, 2, 17, 19
    thr2 = [0.1, 0.3, 0.9]
    k1, k2 = jax.random.split(jax.random.PRNGKey(1))
    out2 = jax.random.normal(k1, (B2, C2, H2, W2), dtype=jnp.float32)
    lbl2 = jax.random.normal(k2, (B2, C2, H2, W2), dtype=jnp.float32)
    pat2 = jax.block_until_ready(pat_loss(out2, lbl2, thr2))
    ref2 = _pat_loss_ref(out2, lbl2, thr2)
    assert pat2.shape == (B2, len(thr2))
    assert jnp.allclose(pat2, ref2, atol=1e-5), (pat2, ref2)

    # --- extra check: forced spatial tiling + tail masking (tiny budget) ---
    B3, C3, H3, W3 = 2, 4, 16, 17   # H*W = 272, not a multiple of 128
    thr3 = [0.05, 0.2, 0.4, 0.6]
    k3, k4 = jax.random.split(jax.random.PRNGKey(2))
    out3 = jax.random.normal(k3, (B3, C3, H3, W3), dtype=jnp.float32)
    lbl3 = jax.random.normal(k4, (B3, C3, H3, W3), dtype=jnp.float32)
    pat3 = jax.block_until_ready(pat_loss(out3, lbl3, thr3, block_budget_bytes=4096))
    ref3 = _pat_loss_ref(out3, lbl3, thr3)
    assert jnp.allclose(pat3, ref3, atol=1e-5), (pat3, ref3)

    print("KERNEL_OK")
</pallas_src>

<mosaic_0001>
module attributes {stable_mosaic.version = 11 : i64} {
  func.func @_pat_kernel(%arg0: i32, %arg1: i32, %arg2: memref<8x256xf32, #tpu.memory_space<vmem>>, %arg3: memref<8x256xf32, #tpu.memory_space<vmem>>, %arg4: memref<8x1xf32, #tpu.memory_space<vmem>>, %arg5: memref<8x1xf32, #tpu.memory_space<vmem>>) attributes {dimension_semantics = [#tpu.dimension_semantics<parallel>, #tpu.dimension_semantics<arbitrary>], iteration_bounds = array<i64: 1, 1>, scalar_prefetch = 0 : i64, scratch_operands = 0 : i64, tpu.core_type = #tpu.core_type<tc>, window_params = [{transform_indices = @transform_0, window_bounds = array<i64: 8, 256>}, {transform_indices = @transform_1, window_bounds = array<i64: 8, 256>}, {transform_indices = @transform_2, window_bounds = array<i64: 8, 1>}, {transform_indices = @transform_3, window_bounds = array<i64: 8, 1>}]} {
    %c0_i32 = arith.constant 0 : i32
    %0 = arith.cmpi eq, %arg1, %c0_i32 : i32
    %1 = arith.extui %0 : i1 to i32
    %c0_i32_0 = arith.constant 0 : i32
    %2 = arith.cmpi ne, %1, %c0_i32_0 : i32
    scf.if %2 {
      %cst_12 = arith.constant 0.000000e+00 : f32
      %20 = vector.broadcast %cst_12 : f32 to vector<8x1xf32>
      %c0_13 = arith.constant 0 : index
      %c0_14 = arith.constant 0 : index
      %21 = vector.load %arg5[%c0_13, %c0_14] : memref<8x1xf32, #tpu.memory_space<vmem>>, vector<8x1xf32>
      tpu.vector_store %arg5[%c0_13, %c0_14], %20 {strides = array<i32>} : memref<8x1xf32, #tpu.memory_space<vmem>>, vector<8x1xf32>,
    } else {
    }
    %c0 = arith.constant 0 : index
    %c0_1 = arith.constant 0 : index
    %3 = vector.load %arg2[%c0, %c0_1] : memref<8x256xf32, #tpu.memory_space<vmem>>, vector<8x256xf32>
    %c0_2 = arith.constant 0 : index
    %c0_3 = arith.constant 0 : index
    %4 = vector.load %arg3[%c0_2, %c0_3] : memref<8x256xf32, #tpu.memory_space<vmem>>, vector<8x256xf32>
    %5 = arith.subf %3, %4 : vector<8x256xf32>
    %6 = math.absf %5 : vector<8x256xf32>
    %c0_4 = arith.constant 0 : index
    %c0_5 = arith.constant 0 : index
    %7 = vector.load %arg4[%c0_4, %c0_5] : memref<8x1xf32, #tpu.memory_space<vmem>>, vector<8x1xf32>
    %8 = vector.broadcast %7 : vector<8x1xf32> to vector<8x256xf32>
    %9 = arith.cmpf ogt, %6, %8 : vector<8x256xf32>
    %10 = arith.extui %9 : vector<8x256xi1> to vector<8x256xi32>
    %11 = arith.sitofp %10 : vector<8x256xi32> to vector<8x256xf32>
    %c0_6 = arith.constant 0 : index
    %c0_7 = arith.constant 0 : index
    %12 = vector.load %arg5[%c0_6, %c0_7] : memref<8x1xf32, #tpu.memory_space<vmem>>, vector<8x1xf32>
    %cst = arith.constant dense<0.000000e+00> : vector<8xf32>
    %13 = vector.multi_reduction <add>, %11, %cst [1] : vector<8x256xf32> to vector<8xf32>
    %14 = vector.shape_cast %13 : vector<8xf32> to vector<8x1xf32>
    %15 = arith.addf %12, %14 : vector<8x1xf32>
    %c0_8 = arith.constant 0 : index
    %c0_9 = arith.constant 0 : index
    %16 = vector.load %arg5[%c0_8, %c0_9] : memref<8x1xf32, #tpu.memory_space<vmem>>, vector<8x1xf32>
    tpu.vector_store %arg5[%c0_8, %c0_9], %15 {strides = array<i32>} : memref<8x1xf32, #tpu.memory_space<vmem>>, vector<8x1xf32>,
    %c0_i32_10 = arith.constant 0 : i32
    %17 = arith.cmpi eq, %arg1, %c0_i32_10 : i32
    %18 = arith.extui %17 : i1 to i32
    %c0_i32_11 = arith.constant 0 : i32
    %19 = arith.cmpi ne, %18, %c0_i32_11 : i32
    scf.if %19 {
      %c0_12 = arith.constant 0 : index
      %c0_13 = arith.constant 0 : index
      %20 = vector.load %arg5[%c0_12, %c0_13] : memref<8x1xf32, #tpu.memory_space<vmem>>, vector<8x1xf32>
      %cst_14 = arith.constant 2.560000e+02 : f32
      %21 = vector.broadcast %cst_14 : f32 to vector<8x1xf32>
      %22 = arith.divf %20, %21 : vector<8x1xf32>
      %cst_15 = arith.constant 1.000000e+02 : f32
      %23 = vector.broadcast %cst_15 : f32 to vector<8x1xf32>
      %24 = arith.mulf %22, %23 : vector<8x1xf32>
      %c0_16 = arith.constant 0 : index
      %c0_17 = arith.constant 0 : index
      %25 = vector.load %arg5[%c0_16, %c0_17] : memref<8x1xf32, #tpu.memory_space<vmem>>, vector<8x1xf32>
      tpu.vector_store %arg5[%c0_16, %c0_17], %24 {strides = array<i32>} : memref<8x1xf32, #tpu.memory_space<vmem>>, vector<8x1xf32>,
    } else {
    }
    return
  }
  func.func @transform_0(%arg0: i32, %arg1: i32) -> (i32, i32) {
    %c0_i32 = arith.constant 0 : i32
    return %arg0, %arg1 : i32, i32
  }
  func.func @transform_1(%arg0: i32, %arg1: i32) -> (i32, i32) {
    %c0_i32 = arith.constant 0 : i32
    return %arg0, %arg1 : i32, i32
  }
  func.func @transform_2(%arg0: i32, %arg1: i32) -> (i32, i32) {
    %c0_i32 = arith.constant 0 : i32
    %c0_i32_0 = arith.constant 0 : i32
    return %arg0, %c0_i32 : i32, i32
  }
  func.func @transform_3(%arg0: i32, %arg1: i32) -> (i32, i32) {
    %c0_i32 = arith.constant 0 : i32
    %c0_i32_0 = arith.constant 0 : i32
    return %arg0, %c0_i32 : i32, i32
  }
}

</mosaic_0001>

<bundles_post_ra>
// kernel: tpu_custom_call.1
= control target key start
LH: loop header
LB: loop body
LE: loop exit
PB: predicated region body
PF: predicated region fallthrough
CT: control target
= control target key end

     0   :  { %8 = vsyncpa [#allocation3], 0  ;;  %s209_s0 = inlined_call_operand.hbm [shape: f32[8,256], index: 0, kind: input, shape index: {}]   ;;  %s210_s1 = inlined_call_operand.hbm [shape: f32[8,256], index: 1, kind: input, shape index: {}]   ;;  %s211_s2 = inlined_call_operand.vmem [shape: f32[8,1], index: 2, kind: input, shape index: {}]   ;;  %s212_s3 = inlined_call_operand.vmem [shape: f32[8,1], index: 3, kind: output, shape index: {}]  }
   0x1   :  { %9 = vsyncpa [#allocation5], 0  ;;  %s140_s12 = smov [#allocation2]   ;;  %s141_s14 = smov [#allocation4]  }
   0x2   :  { %s16_s13 = sshll.u32 %s140_s12, 4  ;;  %s26_s15 = sshll.u32 %s141_s14, 4  ;;  %s17_s13 = int_to_ptr.vmem [resolvable:$true] %s16_s13  ;;  %s27_s15 = int_to_ptr.vmem [resolvable:$true] %s26_s15 }
   0x3   :  { %s92_s18 = scalar_lea.hbm %s209_s0, 256 }
   0x4   :  { %p93_p0 = scmp.ne.s32.totalorder %s209_s0, %s92_s18  ;;  %p96_p1 = scmp.lt.u32.totalorder %s92_s18, %s209_s0 }
   0x6   :  { %p98_p2 = pnand %p96_p1, %p93_p0 }
   0x8   :  { %101 = shalt.err (!%p98_p2)
}
   0x9   :  { %s102_s23 = scalar_lea.vmem %s17_s13, 256  ;;  %p107_p4 = scmp.lt.s32.totalorder %s17_s13, %s17_s13 }
   0xa   :  { %p103_p3 = scmp.ne.s32.totalorder %s17_s13, %s102_s23  ;;  %p108_p5 = scmp.lt.s32.totalorder %s102_s23, %s102_s23 }
   0xc   :  { %p109_p6 = por %p108_p5, %p107_p4 }
   0xe   :  { %p110_p7 = pnand %p109_p6, %p103_p3 }
  0x10   :  { %113 = shalt.err (!%p110_p7)
}
  0x11   :  { %19 = dma.hbm_to_vmem [thread:$0]  %s209_s0, 256, %s17_s13, [#allocation3]  }
  0x12   :  { %s114_s28 = scalar_lea.hbm %s210_s1, 256 }
  0x13   :  { %p115_p8 = scmp.ne.s32.totalorder %s210_s1, %s114_s28  ;;  %p118_p9 = scmp.lt.u32.totalorder %s114_s28, %s210_s1 }
  0x15   :  { %p120_p10 = pnand %p118_p9, %p115_p8 }
  0x17   :  { %123 = shalt.err (!%p120_p10)
}
  0x18   :  { %s124_s6 = scalar_lea.vmem %s27_s15, 256  ;;  %p129_p12 = scmp.lt.s32.totalorder %s27_s15, %s27_s15 }
  0x19   :  { %p125_p11 = scmp.ne.s32.totalorder %s27_s15, %s124_s6  ;;  %p130_p13 = scmp.lt.s32.totalorder %s124_s6, %s124_s6 }
  0x1b   :  { %p131_p0 = por %p130_p13, %p129_p12 }
  0x1d   :  { %p132_p1 = pnand %p131_p0, %p125_p11 }
  0x1f   :  { %135 = shalt.err (!%p132_p1)
}
  0x20   :  { %29 = dma.hbm_to_vmem [thread:$0]  %s210_s1, 256, %s27_s15, [#allocation5]  }
  0x21   :  { %136 = dma.done.wait [#allocation3], 256  }
  0x22   :  { %137 = vsyncadd [#allocation3], 4294967040 }
  0x23   :  { %138 = dma.done.wait [#allocation5], 256  }
  0x24   :  { %139 = vsyncadd [#allocation5], 4294967040  ;;  %v142_v0 = vmov 0   ;;  %v52_v1 = vld [vmem:[%s211_s2] sm:$0xff]  ;;  %vm42_vm0 = vcmask 7168   ;;  %v143_v2 = vmov 0.0  }
  0x25   :  { %91 = vset.pattern.permute.xlu0 %v142_v0  ;;  %43 = vst.msk [vmem:[%s212_s3] sm:$0xff] %vm42_vm0, %v143_v2  ;;  %v44_v3 = vld [vmem:[#allocation2] sm:$0xff]  ;;  %v45_v4 = vld [vmem:[#allocation2 + $0x8] sm:$0xff]  ;;  %v46_v5 = vld [vmem:[#allocation4] sm:$0xff] }
  0x26   :  { %55 = vperm.xlu0 %91, %v52_v1   ;;  %v47_v6 = vld [vmem:[#allocation4 + $0x8] sm:$0xff]  ;;  %v48_v7 = vsub.f32 %v44_v3, %v46_v5 }
  0x27   :  { %v49_v8 = vsub.f32 %v45_v4, %v47_v6 }
  0x28   :  { %v50_v9 = vand.u32 2147483647, %v48_v7 }
  0x29   :  { %v51_v10 = vand.u32 2147483647, %v49_v8 }
  0x2c   :  { %v64_v15 = vld [vmem:[%s212_s3] sm:$0xff] }
  0xa5   :  { %v56_v11 = vpop.permute.xlu0 %55 }
  0xa6   :  { %vm58_vm1 = vcmp.gt.f32.partialorder %v50_v9, %v56_v11  ;;  %vm59_vm2 = vcmp.gt.f32.partialorder %v51_v10, %v56_v11 }
  0xa7   :  { %v85_v12 = vsel %vm58_vm1, 1.0, %v143_v2  ;;  %v86_v13 = vsel %vm59_vm2, 1.0, %v143_v2 }
  0xa8   :  { %v65_v14 = vadd.f32 %v86_v13, %v85_v12 }
  0xaa   :  { %66 = vadd.xlane.f32.xlu0 %v65_v14 }
 0x137   :  { %v67_v16 = vpop.xlane.xlu0 %66 }
 0x138   :  { %v68_v17 = vadd.f32 %v67_v16, %v64_v15 }
 0x13a   :  { %70 = vst.msk [vmem:[%s212_s3] sm:$0xff] %vm42_vm0, %v68_v17 }
 0x141   :  { %v74_v18 = vld [vmem:[%s212_s3] sm:$0xff] }
 0x142   :  { %v76_v19 = vmul.f32 0.00390625, %v74_v18 }
 0x144   :  { %v77_v20 = vmul.f32 100.0, %v76_v19 }
 0x146   :  { %78 = vst.msk [vmem:[%s212_s3] sm:$0xff] %vm42_vm0, %v77_v20 }
 0x147   :  { %83 = vsyncpa [#allocation3], 1 }
 0x148   :  { %84 = vsyncpa [#allocation5], 1 }

</bundles_post_ra>
